<compile_context>
chip_gen: v5e
topology: v5e:2x2
jax: 0.10.0
libtpu: 0.0.40
codegen_flags: <defaults>
</compile_context>

<pallas_src>
import functools

import jax
import jax.numpy as jnp
from jax.experimental import pallas as pl
from jax.experimental.pallas import tpu as pltpu

MARGIN = 2.0          # MARGIN was a free global in the PyTorch source; fixed here deterministically.
_PAIRWISE_EPS = 1e-6  # torch.nn.functional.pairwise_distance default eps


def _round_up(x: int, m: int) -> int:
    return ((x + m - 1) // m) * m


def _contrastive_loss_kernel(x1_ref, x2_ref, label_ref, out_ref, acc_ref, *,
                             tile_b: int, batch: int):
    i = pl.program_id(0)
    n = pl.num_programs(0)

    @pl.when(i == 0)
    def _():
        acc_ref[...] = jnp.zeros_like(acc_ref)

    # Cast to f32 in-kernel (inputs may be bf16); all math stays in f32.
    x1 = x1_ref[...].astype(jnp.float32)                       # (TILE_B, D)
    x2 = x2_ref[...].astype(jnp.float32)                       # (TILE_B, D)
    diff = x1 - x2 + _PAIRWISE_EPS
    sq_sum = jnp.sum(diff * diff, axis=-1, keepdims=True)      # (TILE_B, 1) == d^2

    # Label stays resident in VMEM (constant index_map); slice this tile's rows.
    row0 = pl.multiple_of(i * tile_b, tile_b)
    label = label_ref[pl.ds(row0, tile_b), :]                  # (TILE_B, 1)

    dist = jnp.sqrt(sq_sum)                                    # EUP; hinge path only
    hinge = jnp.maximum(MARGIN - dist, 0.0)
    per_row = (1.0 - label) * sq_sum + label * (hinge * hinge)  # (TILE_B, 1)

    if batch % tile_b != 0:
        # Zero out padded tail rows so they don't contribute to the mean.
        row_ids = row0 + jax.lax.broadcasted_iota(jnp.int32, (tile_b, 1), 0)
        per_row = jnp.where(row_ids < batch, per_row, 0.0)

    acc_ref[...] += jnp.sum(per_row, keepdims=True)            # f32 running sum

    @pl.when(i == n - 1)
    def _():
        out_ref[...] = acc_ref[...] * (1.0 / batch)


def contrastive_loss(output1: jax.Array, output2: jax.Array, label: jax.Array, *,
                     tile_b: int = 512) -> jax.Array:
    """output1, output2: [B, D] (f32 or bf16); label: [B] or [B, 1]. Returns scalar loss."""
    B, D = output1.shape
    assert output2.shape == (B, D)
    label = jnp.asarray(label).reshape(B, 1).astype(jnp.float32)

    # Tile the batch; keep TILE_B a multiple of 8 (sublanes) and <= padded B.
    tile_b = _round_up(min(tile_b, _round_up(B, 8)), 8)
    num_tiles = (B + tile_b - 1) // tile_b
    b_pad = num_tiles * tile_b

    if b_pad != B:
        pad = b_pad - B
        output1 = jnp.pad(output1, ((0, pad), (0, 0)))
        output2 = jnp.pad(output2, ((0, pad), (0, 0)))
        label = jnp.pad(label, ((0, pad), (0, 0)))

    kernel = functools.partial(_contrastive_loss_kernel, tile_b=tile_b, batch=B)

    out = pl.pallas_call(
        kernel,
        out_shape=jax.ShapeDtypeStruct((1, 1), jnp.float32),
        grid=(num_tiles,),
        in_specs=[
            pl.BlockSpec((tile_b, D), lambda i: (i, 0)),       # streamed, double-buffered
            pl.BlockSpec((tile_b, D), lambda i: (i, 0)),       # streamed, double-buffered
            pl.BlockSpec((b_pad, 1), lambda i: (0, 0)),        # label: fetched once, resident
        ],
        out_specs=pl.BlockSpec((1, 1), lambda i: (0, 0)),
        scratch_shapes=[pltpu.VMEM((1, 1), jnp.float32)],      # running f32 sum
        compiler_params=pltpu.CompilerParams(
            dimension_semantics=("arbitrary",),                # shared accumulator -> reduction axis
        ),
    )(output1, output2, label)
    return out[0, 0]


def _reference(output1, output2, label):
    # Pure-JAX reference mirroring the PyTorch forward exactly.
    diff = output1.astype(jnp.float32) - output2.astype(jnp.float32) + _PAIRWISE_EPS
    d = jnp.sqrt(jnp.sum(diff * diff, axis=-1, keepdims=True))
    label = label.reshape(-1, 1).astype(jnp.float32)
    return jnp.mean((1.0 - label) * d ** 2 + label * jnp.maximum(MARGIN - d, 0.0) ** 2)


if __name__ == "__main__":
    key = jax.random.PRNGKey(0)
    k1, k2, k3 = jax.random.split(key, 3)

    # Small face-embedding-like shapes; B chosen non-multiple-of-tile to exercise masking.
    B, D = 20, 256
    output1 = jax.random.normal(k1, (B, D), dtype=jnp.float32)
    output2 = jax.random.normal(k2, (B, D), dtype=jnp.float32)
    label = jax.random.bernoulli(k3, 0.5, (B, 1)).astype(jnp.float32)

    ref = _reference(output1, output2, label)

    # Multi-tile path (tile_b=8 -> 3 tiles, padded tail masked).
    loss_tiled = contrastive_loss(output1, output2, label, tile_b=8)
    jax.block_until_ready(loss_tiled)
    assert jnp.allclose(loss_tiled, ref, rtol=1e-5, atol=1e-5), (loss_tiled, ref)

    # Default (single-tile) path.
    loss_default = contrastive_loss(output1, output2, label)
    jax.block_until_ready(loss_default)
    assert jnp.allclose(loss_default, ref, rtol=1e-5, atol=1e-5), (loss_default, ref)

    print("KERNEL_OK")
</pallas_src>

<mosaic_0001>
module attributes {stable_mosaic.version = 11 : i64} {
  func.func @_contrastive_loss_kernel(%arg0: i32, %arg1: memref<8x256xf32, #tpu.memory_space<vmem>>, %arg2: memref<8x256xf32, #tpu.memory_space<vmem>>, %arg3: memref<24x1xf32, #tpu.memory_space<vmem>>, %arg4: memref<1x1xf32, #tpu.memory_space<vmem>>, %arg5: memref<1x1xf32, #tpu.memory_space<vmem>>) attributes {dimension_semantics = [#tpu.dimension_semantics<arbitrary>], iteration_bounds = array<i64: 3>, scalar_prefetch = 0 : i64, scratch_operands = 1 : i64, tpu.core_type = #tpu.core_type<tc>, window_params = [{transform_indices = @transform_0, window_bounds = array<i64: 8, 256>}, {transform_indices = @transform_1, window_bounds = array<i64: 8, 256>}, {pipeline_mode = #tpu.pipeline_mode<synchronous>, transform_indices = @transform_2, window_bounds = array<i64: 24, 1>}, {pipeline_mode = #tpu.pipeline_mode<synchronous>, transform_indices = @transform_3, window_bounds = array<i64: 1, 1>}]} {
    %c0_i32 = arith.constant 0 : i32
    %0 = arith.cmpi eq, %arg0, %c0_i32 : i32
    %1 = arith.extui %0 : i1 to i32
    %c0_i32_0 = arith.constant 0 : i32
    %2 = arith.cmpi ne, %1, %c0_i32_0 : i32
    scf.if %2 {
      %cst_16 = arith.constant 0.000000e+00 : f32
      %44 = vector.broadcast %cst_16 : f32 to vector<1x1xf32>
      %c0_17 = arith.constant 0 : index
      %c0_18 = arith.constant 0 : index
      %45 = vector.load %arg5[%c0_17, %c0_18] : memref<1x1xf32, #tpu.memory_space<vmem>>, vector<1x1xf32>
      tpu.vector_store %arg5[%c0_17, %c0_18], %44 {strides = array<i32>} : memref<1x1xf32, #tpu.memory_space<vmem>>, vector<1x1xf32>,
    } else {
    }
    %c0 = arith.constant 0 : index
    %c0_1 = arith.constant 0 : index
    %3 = vector.load %arg1[%c0, %c0_1] : memref<8x256xf32, #tpu.memory_space<vmem>>, vector<8x256xf32>
    %c0_2 = arith.constant 0 : index
    %c0_3 = arith.constant 0 : index
    %4 = vector.load %arg2[%c0_2, %c0_3] : memref<8x256xf32, #tpu.memory_space<vmem>>, vector<8x256xf32>
    %5 = arith.subf %3, %4 : vector<8x256xf32>
    %cst = arith.constant 9.99999997E-7 : f32
    %6 = vector.broadcast %cst : f32 to vector<8x256xf32>
    %7 = arith.addf %5, %6 : vector<8x256xf32>
    %8 = arith.mulf %7, %7 : vector<8x256xf32>
    %cst_4 = arith.constant dense<0.000000e+00> : vector<8xf32>
    %9 = vector.multi_reduction <add>, %8, %cst_4 [1] : vector<8x256xf32> to vector<8xf32>
    %10 = vector.shape_cast %9 : vector<8xf32> to vector<8x1xf32>
    %c8_i32 = arith.constant 8 : i32
    %11 = arith.muli %arg0, %c8_i32 : i32
    %12 = tpu.assume_multiple %11, 8 : i32
    %13 = arith.index_cast %12 : i32 to index
    %c0_5 = arith.constant 0 : index
    %14 = vector.load %arg3[%13, %c0_5] : memref<24x1xf32, #tpu.memory_space<vmem>>, vector<8x1xf32>
    %15 = math.sqrt %10 : vector<8x1xf32>
    %cst_6 = arith.constant 2.000000e+00 : f32
    %16 = vector.broadcast %cst_6 : f32 to vector<8x1xf32>
    %17 = arith.subf %16, %15 : vector<8x1xf32>
    %cst_7 = arith.constant 0.000000e+00 : f32
    %18 = vector.broadcast %cst_7 : f32 to vector<8x1xf32>
    %19 = arith.maximumf %17, %18 : vector<8x1xf32>
    %cst_8 = arith.constant 1.000000e+00 : f32
    %20 = vector.broadcast %cst_8 : f32 to vector<8x1xf32>
    %21 = arith.subf %20, %14 : vector<8x1xf32>
    %22 = arith.mulf %21, %10 : vector<8x1xf32>
    %23 = arith.mulf %19, %19 : vector<8x1xf32>
    %24 = arith.mulf %14, %23 : vector<8x1xf32>
    %25 = arith.addf %22, %24 : vector<8x1xf32>
    %26 = tpu.iota {dimensions = array<i32: 0>} : vector<8x1xi32>
    %27 = vector.broadcast %12 : i32 to vector<8x1xi32>
    %28 = arith.addi %27, %26 : vector<8x1xi32>
    %c20_i32 = arith.constant 20 : i32
    %29 = vector.broadcast %c20_i32 : i32 to vector<8x1xi32>
    %30 = arith.cmpi slt, %28, %29 : vector<8x1xi32>
    %cst_9 = arith.constant 0.000000e+00 : f32
    %31 = vector.broadcast %cst_9 : f32 to vector<8x1xf32>
    %32 = arith.select %30, %25, %31 : vector<8x1xi1>, vector<8x1xf32>
    %c0_10 = arith.constant 0 : index
    %c0_11 = arith.constant 0 : index
    %33 = vector.load %arg5[%c0_10, %c0_11] : memref<1x1xf32, #tpu.memory_space<vmem>>, vector<1x1xf32>
    %34 = vector.shape_cast %32 : vector<8x1xf32> to vector<1x8x1xf32>
    %cst_12 = arith.constant dense<0.000000e+00> : vector<1xf32>
    %35 = vector.multi_reduction <add>, %34, %cst_12 [1, 2] : vector<1x8x1xf32> to vector<1xf32>
    %36 = vector.shape_cast %35 : vector<1xf32> to vector<1x1x1xf32>
    %37 = vector.extract %36[0, 0, 0] : f32 from vector<1x1x1xf32>
    %38 = vector.broadcast %37 : f32 to vector<1x1xf32>
    %39 = arith.addf %33, %38 : vector<1x1xf32>
    %c0_13 = arith.constant 0 : index
    %c0_14 = arith.constant 0 : index
    %40 = vector.load %arg5[%c0_13, %c0_14] : memref<1x1xf32, #tpu.memory_space<vmem>>, vector<1x1xf32>
    tpu.vector_store %arg5[%c0_13, %c0_14], %39 {strides = array<i32>} : memref<1x1xf32, #tpu.memory_space<vmem>>, vector<1x1xf32>,
    %c2_i32 = arith.constant 2 : i32
    %41 = arith.cmpi eq, %arg0, %c2_i32 : i32
    %42 = arith.extui %41 : i1 to i32
    %c0_i32_15 = arith.constant 0 : i32
    %43 = arith.cmpi ne, %42, %c0_i32_15 : i32
    scf.if %43 {
      %c0_16 = arith.constant 0 : index
      %c0_17 = arith.constant 0 : index
      %44 = vector.load %arg5[%c0_16, %c0_17] : memref<1x1xf32, #tpu.memory_space<vmem>>, vector<1x1xf32>
      %cst_18 = arith.constant 5.000000e-02 : f32
      %45 = vector.broadcast %cst_18 : f32 to vector<1x1xf32>
      %46 = arith.mulf %44, %45 : vector<1x1xf32>
      %c0_19 = arith.constant 0 : index
      %c0_20 = arith.constant 0 : index
      %47 = vector.load %arg4[%c0_19, %c0_20] : memref<1x1xf32, #tpu.memory_space<vmem>>, vector<1x1xf32>
      tpu.vector_store %arg4[%c0_19, %c0_20], %46 {strides = array<i32>} : memref<1x1xf32, #tpu.memory_space<vmem>>, vector<1x1xf32>,
    } else {
    }
    return
  }
  func.func @transform_0(%arg0: i32) -> (i32, i32) {
    %c0_i32 = arith.constant 0 : i32
    %c0_i32_0 = arith.constant 0 : i32
    return %arg0, %c0_i32 : i32, i32
  }
  func.func @transform_1(%arg0: i32) -> (i32, i32) {
    %c0_i32 = arith.constant 0 : i32
    %c0_i32_0 = arith.constant 0 : i32
    return %arg0, %c0_i32 : i32, i32
  }
  func.func @transform_2(%arg0: i32) -> (i32, i32) {
    %c0_i32 = arith.constant 0 : i32
    %c0_i32_0 = arith.constant 0 : i32
    %c0_i32_1 = arith.constant 0 : i32
    return %c0_i32, %c0_i32_0 : i32, i32
  }
  func.func @transform_3(%arg0: i32) -> (i32, i32) {
    %c0_i32 = arith.constant 0 : i32
    %c0_i32_0 = arith.constant 0 : i32
    %c0_i32_1 = arith.constant 0 : i32
    return %c0_i32, %c0_i32_0 : i32, i32
  }
}

</mosaic_0001>

<bundles_post_ra>
// kernel: tpu_custom_call.1
= control target key start
LH: loop header
LB: loop body
LE: loop exit
PB: predicated region body
PF: predicated region fallthrough
CT: control target
= control target key end

     0   :  { %8 = vsyncpa [#allocation4], 0  ;;  %s733_s0 = inlined_call_operand.hbm [shape: f32[24,256], index: 0, kind: input, shape index: {}]   ;;  %s734_s1 = inlined_call_operand.hbm [shape: f32[24,256], index: 1, kind: input, shape index: {}]   ;;  %s735_s2 = inlined_call_operand.vmem [shape: f32[24,1], index: 2, kind: input, shape index: {}]   ;;  %s736_s3 = inlined_call_operand.hbm [shape: f32[1,1], index: 3, kind: output, shape index: {}]  }
   0x1   :  { %10 = vsyncpa [#allocation4 + $0x1], 0 }
   0x2   :  { %11 = vsyncpa [#allocation7], 0 }
   0x3   :  { %13 = vsyncpa [#allocation7 + $0x1], 0 }
   0x4   :  { %14 = vsyncpa [#allocation5], 0  ;;  %s602_s12 = smov 0   ;;  %s604_s13 = smov 0  }
   0x5   :  { %s606_s14 = smov 0   ;;  %s608_s15 = smov 0  }
   0x6 LB: > { %s621_s16 = sadd.s32 4294967295, %s578_s15   ;;  %s624_s17 = sadd.s32 1, %s578_s15   ;;  %s578_s15 = sphi %s608_s15, %s744_s15   ;;  %s574_s14 = sphi %s606_s14, %s743_s14   ;;  %s570_s13 = sphi %s604_s13, %s742_s13   ;;  %s566_s12 = sphi %s602_s12, %s741_s12  }
   0x7   : > { %s24_s18 = ssub.s32 %s578_s15, %s624_s17  ;;  %s27_s19 = sadd.s32 1, %s574_s14 }
   0x8   : > { %p25_p0 = scmp.eq.s32.totalorder %s24_s18, 0  ;;  %p34_p1 = scmp.ne.s32.totalorder %s574_s14, %s570_s13 }
   0x9   : > { %p35_p2 = scmp.eq.s32.totalorder %s578_s15, 0  ;;  %p40_p3 = scmp.ne.s32.totalorder %s570_s13, %s566_s12 }
   0xa   : > { %s634_s20 = scalar_select %p25_p0, %s574_s14, %s27_s19  }
   0xb   : > { %p636_p4 = por %p35_p2, %p34_p1  ;;  %p41_p5 = scmp.eq.s32.totalorder %s621_s16, 0 }
   0xc   : > { %p409_p6 = scmp.lt.s32.totalorder %s578_s15, 3  ;;  %s647_s23 = sand.u32 1, %s574_s14  }
   0xd   : > { %p642_p7 = por %p41_p5, %p40_p3  ;;  %s374_s24 = sshll.u32 %s647_s23, 4 }
   0xe   : > { %s390_s25 = sshll.u32 %s578_s15, 4  ;;  %s139_s29 = scalar_lea.vmem [#allocation3], %s374_s24 }
   0xf   : > { %s144_s28 = scalar_lea.hbm %s733_s0, %s390_s25  ;;  %s148_s30 = sshll.u32 %s139_s29, 4  ;;  %s149_s30 = int_to_ptr.vmem [resolvable:$true] %s148_s30 }
  0x10   : > { %s146_s4 = sshll.u32 %s144_s28, 4  ;;  %p656_p8 = pnand %p409_p6, %p636_p4  ;;  %s147_s4 = int_to_ptr.hbm [resolvable:$true] %s146_s4 }
  0x11   : > { %p380_p9 = scmp.ge.s32.totalorder %s578_s15, 1  ;;  %p173_p10 = scmp.lt.s32.totalorder %s578_s15, 4 }
  0x12   : > { %s136_s6 = scalar_lea.sflag [#allocation4], %s647_s23  ;;  %s448_s7 = sshra.s32 %s147_s4, 4  ;;  %s449_s7 = int_to_ptr.hbm [resolvable:$true] %s448_s7 }
  0x13   : > { %s450_s8 = scalar_lea.hbm %s449_s7, 16  ;;  %p452_p12 = pneg %p656_p8 }
  0x14   : > { %p451_p11 = scmp.ne.s32.totalorder %s449_s7, %s450_s8  ;;  %s455_s11 = scalar_lea.hbm %s733_s0, 48 }
  0x15   : > { %p456_p1 = scmp.lt.s32.totalorder %s449_s7, %s733_s0  ;;  %p457_p2 = scmp.lt.s32.totalorder %s455_s11, %s450_s8 }
  0x16   : > { %p453_p13 = pnand %p452_p12, %p451_p11 }
  0x17   : > { %p458_p3 = por %p457_p2, %p456_p1 }
  0x18   : > { %p454_p0 = pneg %p453_p13 }
  0x1a   : > { %p459_p4 = pnand %p458_p3, %p454_p0 }
  0x1c   : > { %462 = shalt.err (!%p459_p4)
}
  0x1d   : > { %405 = dma.hbm_to_vmem [thread:$0]  (!%p656_p8), %s147_s4, 256, %s149_s30, %s136_s6  }
  0x1e   : > { %p680_p5 = pnand %p380_p9, %p173_p10  ;;  %s164_s27 = scalar_lea.hbm %s734_s1, %s390_s25 }
  0x1f   : > { %s159_s28 = scalar_lea.vmem [#allocation6], %s374_s24  ;;  %s166_s7 = sshll.u32 %s164_s27, 4  ;;  %s167_s7 = int_to_ptr.hbm [resolvable:$true] %s166_s7 }
  0x20   : > { %s168_s29 = sshll.u32 %s159_s28, 4  ;;  %s156_s8 = scalar_lea.sflag [#allocation7], %s647_s23  ;;  %s169_s29 = int_to_ptr.vmem [resolvable:$true] %s168_s29 }
  0x21   : > { %s478_s9 = sshra.s32 %s167_s7, 4  ;;  %s485_s4 = scalar_lea.hbm %s734_s1, 48  ;;  %s479_s9 = int_to_ptr.hbm [resolvable:$true] %s478_s9 }
  0x22   : > { %s480_s10 = scalar_lea.hbm %s479_s9, 16  ;;  %p486_p11 = scmp.lt.s32.totalorder %s479_s9, %s734_s1 }
  0x23   : > { %p481_p6 = scmp.ne.s32.totalorder %s479_s9, %s480_s10  ;;  %p487_p13 = scmp.lt.s32.totalorder %s485_s4, %s480_s10 }
  0x25   : > { %p483_p9 = pnand %p481_p6, %p452_p12  ;;  %p488_p0 = por %p487_p13, %p486_p11 }
  0x27   : > { %p484_p10 = pneg %p483_p9 }
  0x29   : > { %p489_p1 = pnand %p488_p0, %p484_p10 }
  0x2b   : > { %492 = shalt.err (!%p489_p1)
}
  0x2c   : > { %408 = dma.hbm_to_vmem [thread:$0]  (!%p656_p8), %s167_s7, 256, %s169_s29, %s156_s8  }
  0x2d   : > { %177 = sbr.rel (%p680_p5) target bundleno = 418 (0x1a2), region = 32  ;;  %s179_s23 = sand.u32 (!%p680_p5), 1, %s570_s13  }
  0x2e   : > { %s381_s24 = sshll.u32 (!%p680_p5), %s179_s23, 4  ;;  %s180_s11 = scalar_lea.sflag (!%p680_p5), [#allocation4], %s179_s23 }
  0x2f   : > { %s183_s12 = scalar_lea.vmem (!%p680_p5), [#allocation3], %s381_s24 }
  0x32   : > { %553 = dma.done.wait (%p642_p7), %s180_s11, 256  }
  0x33   : > { %555 = vsyncadd (%p642_p7), %s180_s11, 4294967040  ;;  %s190_s18 = scalar_lea.sflag [#allocation7], %s179_s23  ;;  %s193_s21 = scalar_lea.vmem [#allocation6], %s381_s24 }
  0x34   : > { %557 = dma.done.wait (%p642_p7), %s190_s18, 256  }
  0x35   : > { %559 = vsyncadd (%p642_p7), %s190_s18, 4294967040  ;;  %p383_p8 = scmp.ne.s32.totalorder %s621_s16, 0 }
  0x37   : > { %220 = sbr.rel (%p383_p8) target bundleno = 62 (0x3e), region = 44 }
  0x3c   : > { %vm221_vm0 = vcmask 0   ;;  %v580_v0 = vmov 0.0  }
  0x3d   : > { %222 = vst.msk [vmem:[#allocation2] sm:$0x1] %vm221_vm0, %v580_v0 }
  0x3e PF: > { %v223_v1 = vld [vmem:[%s183_s12] sm:$0xff]  ;;  %v224_v2 = vld [vmem:[%s183_s12 + $0x8] sm:$0xff]  ;;  %s384_s22 = sshll.u32 %s621_s16, 3  ;;  %v258_v19 = vlaneseq  ;;  %vm265_vm4 = vcmask 7168   ;;  %vm278_vm5 = vcmask 0   ;;  %p385_p7 = scmp.ne.s32.totalorder %s621_s16, 2 }
  0x3f   : > { %v225_v3 = vld [vmem:[%s193_s21] sm:$0xff]  ;;  %v226_v4 = vld [vmem:[%s193_s21 + $0x8] sm:$0xff]  ;;  %s237_s26 = scalar_lea.vmem %s735_s2, %s384_s22  ;;  %v260_v27 = vstv %s384_s22 }
  0x40   : > { %v227_v5 = vsub.f32 %v223_v1, %v225_v3  ;;  %v228_v6 = vsub.f32 %v224_v2, %v226_v4  ;;  %v238_v23 = vld [vmem:[%s237_s26] sm:$0xff]  ;;  %v259_v25 = vshrl.u32 %v258_v19, 7 }
  0x41   : > { %v253_v29 = vsub.f32 1.0, %v238_v23 }
  0x42   : > { %v229_v7 = vadd.f32 1e-06, %v227_v5  ;;  %v230_v8 = vadd.f32 1e-06, %v228_v6  ;;  %v261_v30 = vadd.s32 %v260_v27, %v259_v25 }
  0x44   : > { %v231_v9 = vmul.f32 %v229_v7, %v229_v7  ;;  %v232_v10 = vmul.f32 %v230_v8, %v230_v8  ;;  %vm262_vm3 = vcmp.lt.s32.totalorder %v261_v30, 20  ;;  %v264_v44 = vld [vmem:[#allocation2] sm:$0x1] }
  0x46   : > { %v233_v11 = vadd.f32 %v232_v10, %v231_v9 }
  0x48   : > { %234 = vadd.xlane.f32.xlu0 %v233_v11 }
  0xbb   : > { %v235_v12 = vpop.xlane.xlu0 %234 }
  0xbc   : > { %446 = vrsqrt.f32 %v235_v12  ;;  %vm246_vm1 = vcmp.eq.f32.partialorder %v235_v12, inf  ;;  %v249_v21 = vand.u32 2147483648, %v235_v12  ;;  %vm248_vm2 = vcmp.eq.f32.partialorder %v235_v12, 0.0 }
  0xbd   : > { %v254_v32 = vmul.f32 %v253_v29, %v235_v12 }
  0xc2   : > { %v447_v13 = vpop.eup %446 }
  0xc3   : > { %v240_v14 = vmul.f32 %v447_v13, %v235_v12 }
  0xc5   : > { %v241_v15 = vmul.f32 %v447_v13, %v240_v14 }
  0xc7   : > { %v242_v16 = vmul.f32 0.5, %v241_v15 }
  0xc9   : > { %v243_v17 = vsub.f32 1.5, %v242_v16 }
  0xcb   : > { %v244_v18 = vmul.f32 %v447_v13, %v243_v17 }
  0xcd   : > { %v245_v20 = vmul.f32 %v244_v18, %v235_v12 }
  0xcf   : > { %v247_v22 = vsel %vm246_vm1, %v235_v12, %v245_v20 }
  0xd0   : > { %v250_v24 = vsel %vm248_vm2, %v249_v21, %v247_v22 }
  0xd1   : > { %v251_v26 = vsub.f32 2.0, %v250_v24 }
  0xd3   : > { %v252_v28 = vmax.f32 %v251_v26, 0.0 }
  0xd5   : > { %v255_v31 = vmul.f32 %v252_v28, %v252_v28 }
  0xd7   : > { %v256_v33 = vmul.f32 %v255_v31, %v238_v23 }
  0xd9   : > { %v257_v34 = vadd.f32 %v256_v33, %v254_v32 }
  0xdb   : > { %v263_v35 = vsel %vm262_vm3, %v257_v34, 0.0 }
  0xdc   : > { %v266_v36 = vsel %vm265_vm4, %v263_v35, 0.0 }
  0xdd   : > { %267 = vadd.xlane.f32.xlu0 %v266_v36 }
 0x150   : > { %v268_v37 = vpop.xlane.xlu0 %267 }
 0x151   : > { %v269_v38 = vrot.slane %v268_v37, 4 }
 0x153   : > { %v270_v39 = vadd.f32 %v269_v38, %v268_v37 }
 0x155   : > { %v271_v40 = vrot.slane %v270_v39, 2 }
 0x157   : > { %v272_v41 = vadd.f32 %v271_v40, %v270_v39 }
 0x159   : > { %v273_v42 = vrot.slane %v272_v41, 1 }
 0x15b   : > { %v274_v43 = vadd.f32 %v273_v42, %v272_v41 }
 0x15d   : > { %392 = vpush %v274_v43 }
 0x18e   : > { %s393_s27 = spop %392  ;;  %283 = sbr.rel (%p385_p7) target bundleno = 413 (0x19d), region = 48 }
 0x18f   : > { %v276_v45 = vstv %s393_s27 }
 0x190   : > { %v277_v46 = vadd.f32 %v276_v45, %v264_v44 }
 0x192   : > { %279 = vst.msk [vmem:[#allocation2] sm:$0x1] %vm278_vm5, %v277_v46 }
 0x199   : > { %v284_v47 = vld [vmem:[#allocation2] sm:$0x1] }
 0x19a   : > { %v285_v48 = vmul.f32 0.05, %v284_v47 }
 0x19c   : > { %286 = vst.msk [vmem:[#allocation8] sm:$0x1] %vm278_vm5, %v285_v48 }
 0x19d PF: > { %p410_p12 = scmp.eq.s32.totalorder %s621_s16, 2  ;;  %s581_s28 = smov [#allocation8]  }
 0x19e   : > { %s293_s29 = sshll.u32 %s581_s28, 4  ;;  %s295_s9 = sshll.u32 %s736_s3, 4  ;;  %s294_s29 = int_to_ptr.vmem [resolvable:$true] %s293_s29  ;;  %s296_s9 = int_to_ptr.hbm [resolvable:$true] %s295_s9 }
 0x19f   : > { %399 = dma.vmem_to_hbm [thread:$0]  (%p410_p12), %s294_s29, 16, %s296_s9, [#allocation5]  }
 0x1a0   : > { %561 = dma.done.wait (%p410_p12), [#allocation5], 16  }
 0x1a1   : > { %563 = vsyncadd (%p410_p12), [#allocation5], 4294967280 }
 0x1a2 PF: > { %p17_p2 = scmp.ge.s32.totalorder %s624_s17, 5   ;;  %s741_s12 = smov %s570_s13 }
 0x1a3   : > { %s742_s13 = smov %s574_s14  ;;  %s743_s14 = smov %s634_s20 }
 0x1a4   : > { %s744_s15 = smov %s624_s17  ;;  %19 = sbr.rel (!%p17_p2) target bundleno = 6 (0x6), region = 91 }
 0x1a9   :  { %309 = vsyncpa [#allocation4], 1 }
 0x1aa   :  { %311 = vsyncpa [#allocation4 + $0x1], 1 }
 0x1ab   :  { %312 = vsyncpa [#allocation7], 1 }
 0x1ac   :  { %314 = vsyncpa [#allocation7 + $0x1], 1 }
 0x1ad   :  { %315 = vsyncpa [#allocation5], 1 }
 0x1ae   :  { %317 = vsyncpa [#allocation5 + $0x1], 1 }

</bundles_post_ra>
